<compile_context>
chip_gen: v7x
topology: tpu7x:2x2x1
jax: 0.10.0
libtpu: 0.0.40
codegen_flags: <defaults>
</compile_context>

<pallas_src>
import jax
import jax.numpy as jnp
from jax.experimental import pallas as pl
from jax.experimental.pallas import tpu as pltpu


def channel_gate_kernel(x_ref, w_ref, bias_ref, o_ref):
    # x_ref:   (TM, C*L)      native dtype (bf16 feeds the MXU directly)
    # w_ref:   (C*L, CF_pad)  folded mean+conv matrix, same dtype as x
    # bias_ref:(1, CF_pad)    f32 tiled bias              (grid-constant)
    # o_ref:   (TM, CF_pad)   lane-dense output slab, x's dtype
    z = jnp.dot(x_ref[...], w_ref[...], preferred_element_type=jnp.float32)  # MXU
    z = z + bias_ref[...]                                                     # VPU
    # sigmoid(z) == 0.5 * tanh(z / 2) + 0.5 : one EUP push instead of exp+divide.
    o_ref[...] = (0.5 * jnp.tanh(0.5 * z) + 0.5).astype(o_ref.dtype)


def _build_gate_matrix(w, b, C, L):
    """Fold (mean over L) + Conv1d(1->F, K, pad=K//2) into one matrix.

    Depends only on the weights; build once per weight update and reuse.
    Returns (B, bias_row, CF, CF_pad) with
      B[i*L + l, j*F + f] = w[f, 0, i - j + K//2] / L   (0 outside the band).
    """
    F, _, K = w.shape
    pad = K // 2
    CF = C * F
    CF_pad = ((CF + 127) // 128) * 128            # lane-dense output width

    ii = jnp.arange(C)[:, None]
    jj = jnp.arange(C)[None, :]
    kk = ii - jj + pad                            # (C, C)
    valid = (kk >= 0) & (kk < K)
    w_kf = jnp.transpose(w[:, 0, :], (1, 0)).astype(jnp.float32)         # (K, F)
    A = jnp.where(valid[:, :, None], w_kf[jnp.clip(kk, 0, K - 1)], 0.0)  # (C, C, F)

    # Fold the 1/L mean and broadcast over the L positions of each input channel.
    B = jnp.broadcast_to(A[:, None, :, :] / L, (C, L, C, F)).reshape(C * L, CF)
    B = jnp.pad(B, ((0, 0), (0, CF_pad - CF)))

    bias = jnp.pad(jnp.tile(b.astype(jnp.float32), C), (0, CF_pad - CF))
    bias = bias.reshape(1, CF_pad)
    return B, bias, CF, CF_pad


def _pick_tm(N, CL, CF_pad, itemsize, b_bytes, *, vmem_budget=24 * 2**20):
    """Pick the batch tile.

    As large as a ~24 MiB VMEM budget allows (the kernel is HBM-bound; 512+-row
    DMAs sit near the HBM roofline), but:
      * >= 2 grid steps whenever N allows it, so the "parallel" batch axis can
        shard across v7x's two TensorCores;
      * rows aligned to the packed-sublane granularity of x's dtype (8 for f32,
        16 for bf16), and to 128 (MXU M granularity) when large.
    """
    row_align = max(8, 32 // itemsize)
    if N <= row_align:
        return N                                   # block dim == array dim: always legal
    per_row = 2 * (CL + CF_pad) * itemsize         # double-buffered input + output tile
    tm = max(row_align, (vmem_budget - b_bytes) // per_row)
    half = -(-N // 2)                              # ceil(N/2): force >= 2 grid steps
    two_step_cap = -(-half // row_align) * row_align
    tm = min(tm, two_step_cap, 2048)
    if tm >= 128:
        tm = (tm // 128) * 128
    else:
        tm = max(row_align, (tm // row_align) * row_align)
    return int(min(tm, N))


def make_channel_gate(w, b, num_channels, seq_len, *,
                      param_dtype=jnp.float32, tm=None):
    """Build a reusable ChannelGate forward pass.

    Folds mean + Conv1d into B/bias ONCE (they depend only on the weights) and
    returns forward(x: (N, C, L)) -> (N, C, F) in x's dtype.
    """
    C, L = int(num_channels), int(seq_len)
    F = int(w.shape[0])
    B, bias, CF, CF_pad = _build_gate_matrix(w, b, C, L)
    B = B.astype(param_dtype)                     # bf16 B halves its HBM/VMEM bytes
    CL = C * L
    b_bytes = B.size * B.dtype.itemsize + bias.size * bias.dtype.itemsize

    def forward(x):
        N = x.shape[0]
        assert x.shape == (N, C, L), x.shape
        out_dtype = x.dtype
        x_flat = x.reshape(N, CL)                 # contiguous; keep native dtype
        if x_flat.dtype != B.dtype:
            # Keep both MXU operands in one dtype (normally a no-op: param_dtype
            # is chosen to match the activation dtype).
            x_flat = x_flat.astype(B.dtype)

        itemsize = jnp.dtype(out_dtype).itemsize
        tm_ = tm if tm is not None else _pick_tm(N, CL, CF_pad, itemsize, b_bytes)
        grid = (pl.cdiv(N, tm_),)

        # Single-buffered constants + double-buffered x/out tiles, with margin.
        vmem_need = b_bytes + 2 * tm_ * (CL + CF_pad) * itemsize
        vmem_limit = int(min(max(2 * vmem_need, 16 * 2**20), 64 * 2**20))

        out_flat = pl.pallas_call(
            channel_gate_kernel,
            out_shape=jax.ShapeDtypeStruct((N, CF_pad), out_dtype),
            grid=grid,
            in_specs=[
                pl.BlockSpec((tm_, CL), lambda i: (i, 0)),        # batch-tiled x
                # B / bias are grid-constant: single-buffer them (a second buffer
                # buys nothing since the block index never changes).
                pl.BlockSpec((CL, CF_pad), lambda i: (0, 0),
                             pipeline_mode=pl.Buffered(1)),
                pl.BlockSpec((1, CF_pad), lambda i: (0, 0),
                             pipeline_mode=pl.Buffered(1)),
            ],
            out_specs=pl.BlockSpec((tm_, CF_pad), lambda i: (i, 0)),
            compiler_params=pltpu.CompilerParams(
                dimension_semantics=("parallel",),
                vmem_limit_bytes=vmem_limit),
        )(x_flat, B, bias)

        # Consumers that can take the padded (N, CF_pad) slab directly should, to
        # save this extra HBM pass; here we return the module's exact shape.
        out = out_flat if CF == CF_pad else out_flat[:, :CF]
        return out.reshape(N, C, F)

    return forward


def channel_gate(x, w, b, *, tm=None):
    """One-shot convenience wrapper.  For repeated calls (inference loops) use
    make_channel_gate so B/bias are built once per weight update, not per call."""
    N, C, L = x.shape
    return make_channel_gate(w, b, C, L, param_dtype=x.dtype, tm=tm)(x)


def reference(x, w, b):
    """Pure-JAX reference replicating the PyTorch forward exactly."""
    m = jnp.mean(x, axis=2)                       # (N, C)
    N, C = m.shape
    F, _, K = w.shape
    pad = K // 2
    m_pad = jnp.pad(m, ((0, 0), (pad, pad)))
    out = jnp.zeros((N, F, C), dtype=jnp.float32)
    for k in range(K):
        out = out + w[:, 0, k][None, :, None] * m_pad[:, None, k:k + C]
    out = out + b[None, :, None]
    out = jax.nn.sigmoid(out)
    return jnp.transpose(out, (0, 2, 1))          # (N, C, F)


if __name__ == "__main__":
    key = jax.random.PRNGKey(0)
    kx, kw, kb, kx2, kw2, kb2 = jax.random.split(key, 6)

    # Case 1: module-consistent small shapes — batch=2, channels=16, seq=8,
    # ChannelGate(filters=4, kernel_size=3), f32 end-to-end, single grid step.
    N, C, L, F, K = 2, 16, 8, 4, 3
    x = jax.random.normal(kx, (N, C, L), dtype=jnp.float32)
    bound = 1.0 / (1 * K) ** 0.5                  # Conv1d-style uniform init bound
    w = jax.random.uniform(kw, (F, 1, K), minval=-bound, maxval=bound,
                           dtype=jnp.float32)
    b = jax.random.uniform(kb, (F,), minval=-bound, maxval=bound,
                           dtype=jnp.float32)

    gate = make_channel_gate(w, b, C, L, param_dtype=jnp.float32)   # built once
    out = jax.block_until_ready(gate(x))
    ref = reference(x, w, b)
    assert out.shape == (N, C, F), out.shape
    err = float(jnp.max(jnp.abs(out.astype(jnp.float32) - ref)))
    assert err < 2e-3, err

    # Case 2: multi-step pipelined "parallel" grid (auto tm=16 -> 2 steps),
    # bf16 end-to-end (bf16 x, bf16 B, bf16 output), non-power-of-two C/L/F, K=5.
    N2, C2, L2, F2, K2 = 32, 12, 10, 5, 5
    x2 = jax.random.normal(kx2, (N2, C2, L2), dtype=jnp.float32).astype(jnp.bfloat16)
    bound2 = 1.0 / (1 * K2) ** 0.5
    w2 = jax.random.uniform(kw2, (F2, 1, K2), minval=-bound2, maxval=bound2,
                            dtype=jnp.float32)
    b2 = jax.random.uniform(kb2, (F2,), minval=-bound2, maxval=bound2,
                            dtype=jnp.float32)

    gate2 = make_channel_gate(w2, b2, C2, L2, param_dtype=jnp.bfloat16)
    out2 = jax.block_until_ready(gate2(x2))
    ref2 = reference(x2.astype(jnp.float32), w2, b2)
    assert out2.shape == (N2, C2, F2), out2.shape
    assert out2.dtype == jnp.bfloat16, out2.dtype
    err2 = float(jnp.max(jnp.abs(out2.astype(jnp.float32) - ref2)))
    assert err2 < 1e-2, err2

    print("KERNEL_OK")
</pallas_src>

<mosaic_0001>
module attributes {stable_mosaic.version = 11 : i64} {
  func.func @channel_gate_kernel(%arg0: i32, %arg1: memref<2x128xf32, #tpu.memory_space<vmem>>, %arg2: memref<128x128xf32, #tpu.memory_space<vmem>>, %arg3: memref<1x128xf32, #tpu.memory_space<vmem>>, %arg4: memref<2x128xf32, #tpu.memory_space<vmem>>) attributes {dimension_semantics = [#tpu.dimension_semantics<parallel>], iteration_bounds = array<i64: 1>, scalar_prefetch = 0 : i64, scratch_operands = 0 : i64, tpu.core_type = #tpu.core_type<tc>, window_params = [{transform_indices = @transform_0, window_bounds = array<i64: 2, 128>}, {pipeline_mode = #tpu.pipeline_mode<synchronous>, transform_indices = @transform_1, window_bounds = array<i64: 128, 128>}, {pipeline_mode = #tpu.pipeline_mode<synchronous>, transform_indices = @transform_2, window_bounds = array<i64: 1, 128>}, {transform_indices = @transform_3, window_bounds = array<i64: 2, 128>}]} {
    %c0 = arith.constant 0 : index
    %c0_0 = arith.constant 0 : index
    %0 = vector.load %arg1[%c0, %c0_0] : memref<2x128xf32, #tpu.memory_space<vmem>>, vector<2x128xf32>
    %c0_1 = arith.constant 0 : index
    %c0_2 = arith.constant 0 : index
    %1 = vector.load %arg2[%c0_1, %c0_2] : memref<128x128xf32, #tpu.memory_space<vmem>>, vector<128x128xf32>
    %cst = arith.constant dense<0.000000e+00> : vector<2x128xf32>
    %2 = tpu.matmul %0, %1, %cst {dimension_numbers = #tpu.dot_dimension_numbers<[1], [0], [0], [1], [0, 0, 1, 1], [], []>} : vector<2x128xf32>, vector<128x128xf32>, vector<2x128xf32> -> vector<2x128xf32>
    %c0_3 = arith.constant 0 : index
    %c0_4 = arith.constant 0 : index
    %3 = vector.load %arg3[%c0_3, %c0_4] : memref<1x128xf32, #tpu.memory_space<vmem>>, vector<1x128xf32>
    %4 = vector.broadcast %3 : vector<1x128xf32> to vector<2x128xf32>
    %5 = arith.addf %2, %4 : vector<2x128xf32>
    %cst_5 = arith.constant 5.000000e-01 : f32
    %6 = vector.broadcast %cst_5 : f32 to vector<2x128xf32>
    %7 = arith.mulf %6, %5 : vector<2x128xf32>
    %8 = math.tanh %7 : vector<2x128xf32>
    %cst_6 = arith.constant 5.000000e-01 : f32
    %9 = vector.broadcast %cst_6 : f32 to vector<2x128xf32>
    %10 = arith.mulf %9, %8 : vector<2x128xf32>
    %cst_7 = arith.constant 5.000000e-01 : f32
    %11 = vector.broadcast %cst_7 : f32 to vector<2x128xf32>
    %12 = arith.addf %10, %11 : vector<2x128xf32>
    %c0_8 = arith.constant 0 : index
    %c0_9 = arith.constant 0 : index
    %13 = vector.load %arg4[%c0_8, %c0_9] : memref<2x128xf32, #tpu.memory_space<vmem>>, vector<2x128xf32>
    tpu.vector_store %arg4[%c0_8, %c0_9], %12 {strides = array<i32>} : memref<2x128xf32, #tpu.memory_space<vmem>>, vector<2x128xf32>,
    return
  }
  func.func @transform_0(%arg0: i32) -> (i32, i32) {
    %c0_i32 = arith.constant 0 : i32
    %c0_i32_0 = arith.constant 0 : i32
    return %arg0, %c0_i32 : i32, i32
  }
  func.func @transform_1(%arg0: i32) -> (i32, i32) {
    %c0_i32 = arith.constant 0 : i32
    %c0_i32_0 = arith.constant 0 : i32
    %c0_i32_1 = arith.constant 0 : i32
    return %c0_i32, %c0_i32_0 : i32, i32
  }
  func.func @transform_2(%arg0: i32) -> (i32, i32) {
    %c0_i32 = arith.constant 0 : i32
    %c0_i32_0 = arith.constant 0 : i32
    %c0_i32_1 = arith.constant 0 : i32
    return %c0_i32, %c0_i32_0 : i32, i32
  }
  func.func @transform_3(%arg0: i32) -> (i32, i32) {
    %c0_i32 = arith.constant 0 : i32
    %c0_i32_0 = arith.constant 0 : i32
    return %arg0, %c0_i32 : i32, i32
  }
}

</mosaic_0001>

<bundles_post_ra>
// kernel: tpu_custom_call.1
= control target key start
LH: loop header
LB: loop body
LE: loop exit
PB: predicated region body
PF: predicated region fallthrough
CT: control target
= control target key end

     0   :  { %8 = vsyncpa [#allocation3], 0  ;;  %s389_s0 = inlined_call_operand.hbm [shape: f32[2,128], index: 0, kind: input, shape index: {}]   ;;  %s390_s1 = inlined_call_operand.hbm [shape: f32[128,128], index: 1, kind: input, shape index: {}]   ;;  %s391_s2 = inlined_call_operand.vmem [shape: f32[1,128], index: 2, kind: input, shape index: {}]   ;;  %s392_s3 = inlined_call_operand.hbm [shape: f32[2,128], index: 3, kind: output, shape index: {}]  }
   0x1   :  { %9 = vsyncpa [#allocation6], 0 }
   0x2   :  { %10 = vsyncpa [#allocation4], 0  ;;  %s315_s12 = smov [#allocation2]   ;;  %s316_s14 = smov [#allocation5]  }
   0x3   :  { %s17_s13 = sshll.u32 %s315_s12, 4  ;;  %s26_s15 = sshll.u32 %s316_s14, 4  ;;  %s18_s13 = int_to_ptr.vmem [resolvable:$true] %s17_s13  ;;  %s343_s15 = int_to_ptr.vmem [resolvable:$true] %s26_s15 }
   0x4   :  { %s243_s18 = scalar_lea.hbm %s389_s0, 32 }
   0x5   :  { %p244_p0 = scmp.ne.s32.totalorder %s389_s0, %s243_s18  ;;  %p247_p1 = scmp.lt.u32.totalorder %s243_s18, %s389_s0 }
   0x7   :  { %p249_p2 = pnand %p247_p1, %p244_p0 }
   0x9   :  { %252 = shalt.err (!%p249_p2)
}
   0xa   :  { %s253_s23 = scalar_lea.vmem %s18_s13, 32  ;;  %p258_p4 = scmp.lt.s32.totalorder %s18_s13, %s18_s13 }
   0xb   :  { %p254_p3 = scmp.ne.s32.totalorder %s18_s13, %s253_s23  ;;  %p259_p5 = scmp.lt.s32.totalorder %s253_s23, %s253_s23 }
   0xd   :  { %p260_p6 = por %p259_p5, %p258_p4 }
   0xf   :  { %p261_p7 = pnand %p260_p6, %p254_p3 }
  0x11   :  { %264 = shalt.err (!%p261_p7)
}
  0x12   :  { %20 = dma.hbm_to_vmem [thread:$0]  %s389_s0, 32, %s18_s13, [#allocation3]  }
  0x13   :  { %s265_s28 = scalar_lea.hbm %s390_s1, 2048 }
  0x14   :  { %p266_p8 = scmp.ne.s32.totalorder %s390_s1, %s265_s28  ;;  %p269_p9 = scmp.lt.u32.totalorder %s265_s28, %s390_s1 }
  0x16   :  { %p271_p10 = pnand %p269_p9, %p266_p8 }
  0x18   :  { %274 = shalt.err (!%p271_p10)
}
  0x19   :  { %s275_s6 = scalar_lea.vmem %s343_s15, 2048  ;;  %p280_p12 = scmp.lt.s32.totalorder %s343_s15, %s343_s15 }
  0x1a   :  { %p276_p11 = scmp.ne.s32.totalorder %s343_s15, %s275_s6  ;;  %p281_p13 = scmp.lt.s32.totalorder %s275_s6, %s275_s6 }
  0x1c   :  { %p282_p0 = por %p281_p13, %p280_p12 }
  0x1e   :  { %p283_p1 = pnand %p282_p0, %p276_p11 }
  0x20   :  { %286 = shalt.err (!%p283_p1)
}
  0x21   :  { %s317_s0 = smov 128   ;;  %s318_s7 = smov 8  }
  0x22   :  { %32 = dma.hbm_to_vmem [thread:$0]  %s390_s1, 2048, %s343_s15, [#allocation6], %s317_s0, %s317_s0, %s318_s7  }
  0x23   :  { %309 = dma.done.wait [#allocation3], 32  }
  0x24   :  { %310 = vsyncadd [#allocation3], 4294967264 }
  0x25   :  { %311 = dma.done.wait [#allocation6], 2048  }
  0x26   :  { %312 = vsyncadd [#allocation6], 4294965248  ;;  %v319_v0 = vmov 0.0|0.0   ;;  %vm320_vm0 = vmmov 0   ;;  %v321_v1 = vmov 0.0   ;;  %v42_v2 = vld [vmem:[#allocation5] sm:$0xff] }
  0x27   :  { %209 = vmatprep.subr.bf16.mxu0 %v319_v0  ;;  %206 = vmatprep.mubr.msk.f32.mxu0 %vm320_vm0, %v321_v1  ;;  %v43_v3 = vld [vmem:[#allocation5 + $0x8] sm:$0xff]  ;;  %v44_v4 = vld [vmem:[#allocation5 + $0x10] sm:$0xff]  ;;  %v45_v6 = vld [vmem:[#allocation5 + $0x18] sm:$0xff]  ;;  %s322_s11 = smov [#allocation7]  }
  0x28   :  { %v210_v5 = vpack.c.bf16 %v43_v3, %v42_v2  ;;  %v213_v7 = vpack.c.bf16 %v45_v6, %v44_v4  ;;  %v46_v8 = vld [vmem:[#allocation5 + $0x20] sm:$0xff]  ;;  %v47_v9 = vld [vmem:[#allocation5 + $0x28] sm:$0xff]  ;;  %v48_v11 = vld [vmem:[#allocation5 + $0x30] sm:$0xff]  ;;  %s146_s12 = sshll.u32 %s322_s11, 4  ;;  %s147_s12 = int_to_ptr.vmem [resolvable:$true] %s146_s12 }
  0x29   :  { %v216_v10 = vpack.c.bf16 %v47_v9, %v46_v8  ;;  %v49_v12 = vld [vmem:[#allocation5 + $0x38] sm:$0xff]  ;;  %v50_v14 = vld [vmem:[#allocation5 + $0x40] sm:$0xff]  ;;  %v51_v15 = vld [vmem:[#allocation5 + $0x48] sm:$0xff]  ;;  %s287_s13 = scalar_lea.vmem %s147_s12, 32  ;;  %p292_p3 = scmp.lt.s32.totalorder %s147_s12, %s147_s12 }
  0x2a   :  { %211 = vmatpush3.bf16.msra.mxu0 %v210_v5  ;;  %v219_v13 = vpack.c.bf16 %v49_v12, %v48_v11  ;;  %v222_v16 = vpack.c.bf16 %v51_v15, %v50_v14  ;;  %v52_v17 = vld [vmem:[#allocation5 + $0x50] sm:$0xff]  ;;  %v53_v18 = vld [vmem:[#allocation5 + $0x58] sm:$0xff]  ;;  %v54_v20 = vld [vmem:[#allocation5 + $0x60] sm:$0xff]  ;;  %p288_p2 = scmp.ne.s32.totalorder %s147_s12, %s287_s13  ;;  %p293_p4 = scmp.lt.s32.totalorder %s287_s13, %s287_s13 }
  0x2b   :  { %212 = vmatprep.subr.bf16.mxu0 %v319_v0  ;;  %v225_v19 = vpack.c.bf16 %v53_v18, %v52_v17  ;;  %v55_v21 = vld [vmem:[#allocation5 + $0x68] sm:$0xff]  ;;  %v56_v23 = vld [vmem:[#allocation5 + $0x70] sm:$0xff]  ;;  %v57_v24 = vld [vmem:[#allocation5 + $0x78] sm:$0xff] }
  0x2c   :  { %v228_v22 = vpack.c.bf16 %v55_v21, %v54_v20  ;;  %v231_v25 = vpack.c.bf16 %v57_v24, %v56_v23  ;;  %v41_v26 = vld [vmem:[#allocation2] sm:$0x3]  ;;  %p294_p5 = por %p293_p4, %p292_p3 }
  0x2d   :  { %v156_v27 = vld [vmem:[%s391_s2] ss:$0 sm:$0xff] }
  0x2e   :  { %214 = vmatpush3.bf16.msra.mxu0 %v213_v7  ;;  %p295_p6 = pnand %p294_p5, %p288_p2 }
  0x2f   :  { %215 = vmatprep.subr.bf16.mxu0 %v319_v0 }
  0x32   :  { %217 = vmatpush3.bf16.msra.mxu0 %v216_v10 }
  0x33   :  { %218 = vmatprep.subr.bf16.mxu0 %v319_v0 }
  0x36   :  { %220 = vmatpush3.bf16.msra.mxu0 %v219_v13 }
  0x37   :  { %221 = vmatprep.subr.bf16.mxu0 %v319_v0 }
  0x3a   :  { %223 = vmatpush3.bf16.msra.mxu0 %v222_v16 }
  0x3b   :  { %224 = vmatprep.subr.bf16.mxu0 %v319_v0 }
  0x3e   :  { %226 = vmatpush3.bf16.msra.mxu0 %v225_v19 }
  0x3f   :  { %227 = vmatprep.subr.bf16.mxu0 %v319_v0 }
  0x42   :  { %229 = vmatpush3.bf16.msra.mxu0 %v228_v22 }
  0x43   :  { %230 = vmatprep.subr.bf16.mxu0 %v319_v0 }
  0x46   :  { %232 = vmatpush3.bf16.msra.mxu0 %v231_v25 }
  0x49   :  { %207 = vmatmul.mubr.f32.vlgmr.msra.gmra.mrb[0].mxu0 %v41_v26 }
 0x11c   :  { %v131_v28 = vpop.f32.mrb[0].mxu0 }
 0x11d   :  { %v132_v29 = vadd.f32 %v156_v27, %v131_v28  ;;  %v208_v30 = vpop.f32.mrb[1].mxu0 }
 0x11f   :  { %v135_v31 = vmul.f32 0.5, %v132_v29 }
 0x121   :  { %241 = vtanh.f32 %v135_v31 }
 0x12b   :  { %v242_v32 = vpop.eup %241 }
 0x12c   :  { %v137_v33 = vmul.f32 0.5, %v242_v32 }
 0x12e   :  { %v138_v34 = vadd.f32 0.5, %v137_v33 }
 0x130   :  { %139 = vst [vmem:[#allocation7] sm:$0x3] %v138_v34 }
 0x131   :  { %298 = shalt.err (!%p295_p6)
}
 0x132   :  { %s299_s15 = scalar_lea.hbm %s392_s3, 32 }
 0x133   :  { %p300_p7 = scmp.ne.s32.totalorder %s392_s3, %s299_s15  ;;  %p303_p8 = scmp.lt.u32.totalorder %s299_s15, %s392_s3 }
 0x135   :  { %p305_p9 = pnand %p303_p8, %p300_p7 }
 0x137   :  { %308 = shalt.err (!%p305_p9)
}
 0x138   :  { %149 = dma.vmem_to_hbm [thread:$0]  %s147_s12, 32, %s392_s3, [#allocation4]  }
 0x139   :  { %313 = dma.done.wait [#allocation4], 32  }
 0x13a   :  { %314 = vsyncadd [#allocation4], 4294967264 }
 0x13b   :  { %153 = vsyncpa [#allocation3], 1 }
 0x13c   :  { %154 = vsyncpa [#allocation6], 1 }
 0x13d   :  { %155 = vsyncpa [#allocation4], 1 }

</bundles_post_ra>
